<compile_context>
chip_gen: v5e
topology: v5e:2x2
jax: 0.10.0
libtpu: 0.0.40
codegen_flags: <defaults>
</compile_context>

<pallas_src>
import jax
import jax.numpy as jnp
from jax.experimental import pallas as pl
from jax.experimental.pallas import tpu as pltpu


def _fmmlp_kernel(x_ref, w1_ref, b1_ref, w2_ref, b2_ref, wh_ref, bh_ref, o_ref):
    bf16 = jnp.bfloat16
    # projector_head layer 1: Linear(E->H) + ReLU (Dropout = identity at inference)
    h = jnp.dot(x_ref[...], w1_ref[...], preferred_element_type=jnp.float32)
    h = jnp.maximum(h + b1_ref[...], 0.0)
    # projector_head layer 2: Linear(H->H) + ReLU
    h = jnp.dot(h.astype(bf16), w2_ref[...], preferred_element_type=jnp.float32)
    h = jnp.maximum(h + b2_ref[...], 0.0)
    # fused head: Linear(H->P) folded with regression Linear(P->C)  (padded to 128 lanes)
    out = jnp.dot(h.astype(bf16), wh_ref[...], preferred_element_type=jnp.float32)
    o_ref[...] = out + bh_ref[...]


def fmmlp_forward(embedding, params, *, tm=128):
    """embedding: [B, E] float32.  params: dict of f32 weights/biases (torch layout
    transposed: weights stored as [in_features, out_features])."""
    B, E = embedding.shape
    H = params["w1"].shape[1]
    C = params["wr"].shape[1]
    f32, bf16 = jnp.float32, jnp.bfloat16

    # --- algebraic fusion of the last two linears (no nonlinearity between them):
    #     (h @ w3 + b3) @ wr + br == h @ (w3 @ wr) + (b3 @ wr + br)
    wh = params["w3"] @ params["wr"]                       # (H, C)  f32
    bh = params["b3"] @ params["wr"] + params["br"]        # (1, C)  f32

    # --- lane-dense output: pad the head output dim up to a multiple of 128
    c_pad = ((C + 127) // 128) * 128
    wh = jnp.pad(wh, ((0, 0), (0, c_pad - C)))
    bh = jnp.pad(bh, ((0, 0), (0, c_pad - C)))

    # --- bf16 matmul operands (f32 accumulation in-kernel); biases stay f32
    w1 = params["w1"].astype(bf16)
    w2 = params["w2"].astype(bf16)
    wh = wh.astype(bf16)
    b1, b2 = params["b1"], params["b2"]

    # --- batch grid: row tile tm (multiple of 8); pad batch so it divides evenly
    tm = min(tm, max(8, ((B + 7) // 8) * 8))
    b_pad = ((B + tm - 1) // tm) * tm
    x = embedding.astype(bf16)
    if b_pad != B:
        x = jnp.pad(x, ((0, b_pad - B), (0, 0)))

    const2 = lambda shape: pl.BlockSpec(shape, lambda i: (0, 0))  # VMEM-resident weights

    out = pl.pallas_call(
        _fmmlp_kernel,
        out_shape=jax.ShapeDtypeStruct((b_pad, c_pad), f32),
        grid=(b_pad // tm,),
        in_specs=[
            pl.BlockSpec((tm, E), lambda i: (i, 0)),   # streamed activation rows
            const2((E, H)), const2((1, H)),
            const2((H, H)), const2((1, H)),
            const2((H, c_pad)), const2((1, c_pad)),
        ],
        out_specs=pl.BlockSpec((tm, c_pad), lambda i: (i, 0)),
        compiler_params=pltpu.CompilerParams(
            dimension_semantics=("parallel",)),        # megacore sharding on v7x
    )(x, w1, b1, w2, b2, wh, bh)

    return out[:B, :C]


def init_params(key, embed_dim, hidden_dim, proj_dim, num_cls):
    """Deterministic init mimicking torch.nn.Linear (uniform ±1/sqrt(fan_in)).
    Weights stored as [in_features, out_features]."""
    ks = jax.random.split(key, 8)

    def lin(kw, kb, fan_in, fan_out):
        bound = 1.0 / jnp.sqrt(fan_in)
        w = jax.random.uniform(kw, (fan_in, fan_out), jnp.float32, -bound, bound)
        b = jax.random.uniform(kb, (1, fan_out), jnp.float32, -bound, bound)
        return w, b

    w1, b1 = lin(ks[0], ks[1], embed_dim, hidden_dim)
    w2, b2 = lin(ks[2], ks[3], hidden_dim, hidden_dim)
    w3, b3 = lin(ks[4], ks[5], hidden_dim, proj_dim)
    wr, br = lin(ks[6], ks[7], proj_dim, num_cls)
    return dict(w1=w1, b1=b1, w2=w2, b2=b2, w3=w3, b3=b3, wr=wr, br=br)


def reference_forward_f32(embedding, p):
    """Pure f32 reference matching the PyTorch module semantics."""
    h = jnp.maximum(embedding @ p["w1"] + p["b1"], 0.0)
    h = jnp.maximum(h @ p["w2"] + p["b2"], 0.0)
    proj = h @ p["w3"] + p["b3"]
    return proj @ p["wr"] + p["br"]


def reference_forward_matched(embedding, p):
    """Reference that mirrors the kernel's numerics (bf16 operands, f32 accum,
    fused projector+regression head)."""
    bf16, f32 = jnp.bfloat16, jnp.float32
    wh = p["w3"] @ p["wr"]
    bh = p["b3"] @ p["wr"] + p["br"]
    h = jnp.dot(embedding.astype(bf16), p["w1"].astype(bf16),
                preferred_element_type=f32)
    h = jnp.maximum(h + p["b1"], 0.0)
    h = jnp.dot(h.astype(bf16), p["w2"].astype(bf16), preferred_element_type=f32)
    h = jnp.maximum(h + p["b2"], 0.0)
    out = jnp.dot(h.astype(bf16), wh.astype(bf16), preferred_element_type=f32)
    return out + bh


if __name__ == "__main__":
    # Small shapes consistent with the module's forward:
    #   backbone embedding dim E=32, hidden_dim=32, proj_dim=16, num_cls=4, batch=8
    B, E, H, P, C = 8, 32, 32, 16, 4

    key = jax.random.PRNGKey(0)
    k_emb, k_params = jax.random.split(key)
    embedding = jax.random.normal(k_emb, (B, E), jnp.float32)  # backbone output
    params = init_params(k_params, E, H, P, C)

    out = fmmlp_forward(embedding, params)
    out = jax.block_until_ready(out)
    assert out.shape == (B, C)

    # Tight check against a reference with identical numerics (bf16 MXU operands).
    ref_m = reference_forward_matched(embedding, params)
    assert jnp.allclose(out, ref_m, atol=2e-3, rtol=2e-3), "mismatch vs matched reference"

    # Loose semantic check against the pure-f32 module math.
    ref_f32 = reference_forward_f32(embedding, params)
    assert jnp.allclose(out, ref_f32, atol=5e-2, rtol=5e-2), "mismatch vs f32 reference"

    print("KERNEL_OK")
</pallas_src>

<mosaic_0001>
module attributes {stable_mosaic.version = 11 : i64} {
  func.func @_fmmlp_kernel(%arg0: i32, %arg1: memref<8x32xbf16, #tpu.memory_space<vmem>>, %arg2: memref<32x32xbf16, #tpu.memory_space<vmem>>, %arg3: memref<1x32xf32, #tpu.memory_space<vmem>>, %arg4: memref<32x32xbf16, #tpu.memory_space<vmem>>, %arg5: memref<1x32xf32, #tpu.memory_space<vmem>>, %arg6: memref<32x128xbf16, #tpu.memory_space<vmem>>, %arg7: memref<1x128xf32, #tpu.memory_space<vmem>>, %arg8: memref<8x128xf32, #tpu.memory_space<vmem>>) attributes {dimension_semantics = [#tpu.dimension_semantics<parallel>], iteration_bounds = array<i64: 1>, scalar_prefetch = 0 : i64, scratch_operands = 0 : i64, tpu.core_type = #tpu.core_type<tc>, window_params = [{transform_indices = @transform_0, window_bounds = array<i64: 8, 32>}, {pipeline_mode = #tpu.pipeline_mode<synchronous>, transform_indices = @transform_1, window_bounds = array<i64: 32, 32>}, {pipeline_mode = #tpu.pipeline_mode<synchronous>, transform_indices = @transform_2, window_bounds = array<i64: 1, 32>}, {pipeline_mode = #tpu.pipeline_mode<synchronous>, transform_indices = @transform_3, window_bounds = array<i64: 32, 32>}, {pipeline_mode = #tpu.pipeline_mode<synchronous>, transform_indices = @transform_4, window_bounds = array<i64: 1, 32>}, {pipeline_mode = #tpu.pipeline_mode<synchronous>, transform_indices = @transform_5, window_bounds = array<i64: 32, 128>}, {pipeline_mode = #tpu.pipeline_mode<synchronous>, transform_indices = @transform_6, window_bounds = array<i64: 1, 128>}, {transform_indices = @transform_7, window_bounds = array<i64: 8, 128>}]} {
    %c0 = arith.constant 0 : index
    %c0_0 = arith.constant 0 : index
    %0 = vector.load %arg1[%c0, %c0_0] : memref<8x32xbf16, #tpu.memory_space<vmem>>, vector<8x32xbf16>
    %c0_1 = arith.constant 0 : index
    %c0_2 = arith.constant 0 : index
    %1 = vector.load %arg2[%c0_1, %c0_2] : memref<32x32xbf16, #tpu.memory_space<vmem>>, vector<32x32xbf16>
    %cst = arith.constant dense<0.000000e+00> : vector<8x32xf32>
    %2 = tpu.matmul %0, %1, %cst {dimension_numbers = #tpu.dot_dimension_numbers<[1], [0], [0], [1], [0, 0, 1, 1], [], []>} : vector<8x32xbf16>, vector<32x32xbf16>, vector<8x32xf32> -> vector<8x32xf32>
    %c0_3 = arith.constant 0 : index
    %c0_4 = arith.constant 0 : index
    %3 = vector.load %arg3[%c0_3, %c0_4] : memref<1x32xf32, #tpu.memory_space<vmem>>, vector<1x32xf32>
    %4 = vector.broadcast %3 : vector<1x32xf32> to vector<8x32xf32>
    %5 = arith.addf %2, %4 : vector<8x32xf32>
    %cst_5 = arith.constant 0.000000e+00 : f32
    %6 = vector.broadcast %cst_5 : f32 to vector<8x32xf32>
    %7 = arith.maximumf %5, %6 : vector<8x32xf32>
    %8 = arith.truncf %7 : vector<8x32xf32> to vector<8x32xbf16>
    %c0_6 = arith.constant 0 : index
    %c0_7 = arith.constant 0 : index
    %9 = vector.load %arg4[%c0_6, %c0_7] : memref<32x32xbf16, #tpu.memory_space<vmem>>, vector<32x32xbf16>
    %cst_8 = arith.constant dense<0.000000e+00> : vector<8x32xf32>
    %10 = tpu.matmul %8, %9, %cst_8 {dimension_numbers = #tpu.dot_dimension_numbers<[1], [0], [0], [1], [0, 0, 1, 1], [], []>} : vector<8x32xbf16>, vector<32x32xbf16>, vector<8x32xf32> -> vector<8x32xf32>
    %c0_9 = arith.constant 0 : index
    %c0_10 = arith.constant 0 : index
    %11 = vector.load %arg5[%c0_9, %c0_10] : memref<1x32xf32, #tpu.memory_space<vmem>>, vector<1x32xf32>
    %12 = vector.broadcast %11 : vector<1x32xf32> to vector<8x32xf32>
    %13 = arith.addf %10, %12 : vector<8x32xf32>
    %cst_11 = arith.constant 0.000000e+00 : f32
    %14 = vector.broadcast %cst_11 : f32 to vector<8x32xf32>
    %15 = arith.maximumf %13, %14 : vector<8x32xf32>
    %16 = arith.truncf %15 : vector<8x32xf32> to vector<8x32xbf16>
    %c0_12 = arith.constant 0 : index
    %c0_13 = arith.constant 0 : index
    %17 = vector.load %arg6[%c0_12, %c0_13] : memref<32x128xbf16, #tpu.memory_space<vmem>>, vector<32x128xbf16>
    %cst_14 = arith.constant dense<0.000000e+00> : vector<8x128xf32>
    %18 = tpu.matmul %16, %17, %cst_14 {dimension_numbers = #tpu.dot_dimension_numbers<[1], [0], [0], [1], [0, 0, 1, 1], [], []>} : vector<8x32xbf16>, vector<32x128xbf16>, vector<8x128xf32> -> vector<8x128xf32>
    %c0_15 = arith.constant 0 : index
    %c0_16 = arith.constant 0 : index
    %19 = vector.load %arg7[%c0_15, %c0_16] : memref<1x128xf32, #tpu.memory_space<vmem>>, vector<1x128xf32>
    %20 = vector.broadcast %19 : vector<1x128xf32> to vector<8x128xf32>
    %21 = arith.addf %18, %20 : vector<8x128xf32>
    %c0_17 = arith.constant 0 : index
    %c0_18 = arith.constant 0 : index
    %22 = vector.load %arg8[%c0_17, %c0_18] : memref<8x128xf32, #tpu.memory_space<vmem>>, vector<8x128xf32>
    tpu.vector_store %arg8[%c0_17, %c0_18], %21 {strides = array<i32>} : memref<8x128xf32, #tpu.memory_space<vmem>>, vector<8x128xf32>,
    return
  }
  func.func @transform_0(%arg0: i32) -> (i32, i32) {
    %c0_i32 = arith.constant 0 : i32
    %c0_i32_0 = arith.constant 0 : i32
    return %arg0, %c0_i32 : i32, i32
  }
  func.func @transform_1(%arg0: i32) -> (i32, i32) {
    %c0_i32 = arith.constant 0 : i32
    %c0_i32_0 = arith.constant 0 : i32
    %c0_i32_1 = arith.constant 0 : i32
    return %c0_i32, %c0_i32_0 : i32, i32
  }
  func.func @transform_2(%arg0: i32) -> (i32, i32) {
    %c0_i32 = arith.constant 0 : i32
    %c0_i32_0 = arith.constant 0 : i32
    %c0_i32_1 = arith.constant 0 : i32
    return %c0_i32, %c0_i32_0 : i32, i32
  }
  func.func @transform_3(%arg0: i32) -> (i32, i32) {
    %c0_i32 = arith.constant 0 : i32
    %c0_i32_0 = arith.constant 0 : i32
    %c0_i32_1 = arith.constant 0 : i32
    return %c0_i32, %c0_i32_0 : i32, i32
  }
  func.func @transform_4(%arg0: i32) -> (i32, i32) {
    %c0_i32 = arith.constant 0 : i32
    %c0_i32_0 = arith.constant 0 : i32
    %c0_i32_1 = arith.constant 0 : i32
    return %c0_i32, %c0_i32_0 : i32, i32
  }
  func.func @transform_5(%arg0: i32) -> (i32, i32) {
    %c0_i32 = arith.constant 0 : i32
    %c0_i32_0 = arith.constant 0 : i32
    %c0_i32_1 = arith.constant 0 : i32
    return %c0_i32, %c0_i32_0 : i32, i32
  }
  func.func @transform_6(%arg0: i32) -> (i32, i32) {
    %c0_i32 = arith.constant 0 : i32
    %c0_i32_0 = arith.constant 0 : i32
    %c0_i32_1 = arith.constant 0 : i32
    return %c0_i32, %c0_i32_0 : i32, i32
  }
  func.func @transform_7(%arg0: i32) -> (i32, i32) {
    %c0_i32 = arith.constant 0 : i32
    %c0_i32_0 = arith.constant 0 : i32
    return %arg0, %c0_i32 : i32, i32
  }
}

</mosaic_0001>

<bundles_post_ra>
// kernel: tpu_custom_call.1
= control target key start
LH: loop header
LB: loop body
LE: loop exit
PB: predicated region body
PF: predicated region fallthrough
CT: control target
= control target key end

     0   :  { %12 = vsyncpa [#allocation3], 0  ;;  %s468_s0 = inlined_call_operand.hbm [shape: bf16[8,32], index: 0, kind: input, shape index: {}]   ;;  %s469_s1 = inlined_call_operand.hbm [shape: bf16[32,32], index: 1, kind: input, shape index: {}]   ;;  %s470_s2 = inlined_call_operand.vmem [shape: f32[1,32], index: 2, kind: input, shape index: {}]   ;;  %s471_s3 = inlined_call_operand.hbm [shape: bf16[32,32], index: 3, kind: input, shape index: {}]   ;;  %s472_s4 = inlined_call_operand.vmem [shape: f32[1,32], index: 4, kind: input, shape index: {}]   ;;  %s473_s5 = inlined_call_operand.hbm [shape: bf16[32,128], index: 5, kind: input, shape index: {}]   ;;  %s474_s6 = inlined_call_operand.vmem [shape: f32[1,128], index: 6, kind: input, shape index: {}]   ;;  %s475_s7 = inlined_call_operand.hbm [shape: f32[8,128], index: 7, kind: output, shape index: {}]  }
   0x1   :  { %13 = vsyncpa [#allocation6], 0 }
   0x2   :  { %14 = vsyncpa [#allocation9], 0  ;;  %s31_s26 = sshll.u32 %s469_s1, 4  ;;  %s32_s26 = int_to_ptr.hbm [resolvable:$true] %s31_s26 }
   0x3   :  { %15 = vsyncpa [#allocation4], 0  ;;  %s394_s27 = smov [#allocation5]   ;;  %s21_s8 = sshll.u32 %s468_s0, 4  ;;  %s22_s8 = int_to_ptr.hbm [resolvable:$true] %s21_s8 }
   0x4   :  { %s33_s28 = sshll.u32 %s394_s27, 4  ;;  %s395_s9 = smov 64   ;;  %s34_s28 = int_to_ptr.vmem [resolvable:$true] %s33_s28 }
   0x5   :  { %s396_s10 = smov 4   ;;  %s397_s11 = smov [#allocation2]  }
   0x6   :  { %39 = dma.hbm_to_vmem [thread:$0]  %s32_s26, 256, %s34_s28, [#allocation6], %s395_s9, %s395_s9, %s396_s10  }
   0x7   :  { %s23_s12 = sshll.u32 %s397_s11, 4  ;;  %s46_s15 = sshll.u32 %s471_s3, 4  ;;  %s24_s12 = int_to_ptr.vmem [resolvable:$true] %s23_s12  ;;  %s47_s15 = int_to_ptr.hbm [resolvable:$true] %s46_s15 }
   0x8   :  { %26 = dma.hbm_to_vmem [thread:$0]  %s22_s8, 64, %s24_s12, [#allocation3]  }
   0x9   :  { %s61_s17 = sshll.u32 %s473_s5, 4  ;;  %s398_s18 = smov [#allocation7]   ;;  %s62_s17 = int_to_ptr.hbm [resolvable:$true] %s61_s17 }
   0xa   :  { %s48_s19 = sshll.u32 %s398_s18, 4  ;;  %s399_s0 = smov [#allocation8]   ;;  %s49_s19 = int_to_ptr.vmem [resolvable:$true] %s48_s19 }
   0xb   :  { %54 = dma.hbm_to_vmem [thread:$0]  %s47_s15, 256, %s49_s19, [#allocation6], %s395_s9, %s395_s9, %s396_s10  }
   0xc   :  { %s63_s20 = sshll.u32 %s399_s0, 4  ;;  %s64_s20 = int_to_ptr.vmem [resolvable:$true] %s63_s20 }
   0xd   :  { %69 = dma.hbm_to_vmem [thread:$0]  %s62_s17, 256, %s64_s20, [#allocation9], %s395_s9, %s395_s9, %s396_s10  }
   0xe   :  { %386 = dma.done.wait [#allocation3], 64  }
   0xf   :  { %387 = vsyncadd [#allocation3], 4294967232 }
  0x10   :  { %388 = dma.done.wait [#allocation6], 512  }
  0x11   :  { %389 = vsyncadd [#allocation6], 4294966784 }
  0x12   :  { %390 = dma.done.wait [#allocation9], 256  }
  0x13   :  { %391 = vsyncadd [#allocation9], 4294967040  ;;  %v251_v0 = vld [vmem:[#allocation5 + $0x8] sm:$0xff]  ;;  %v250_v1 = vld [vmem:[#allocation5] sm:$0xff]  ;;  %vm110_vm0 = vcmask 261120   ;;  %s400_s24 = smov [#allocation10]  }
  0x14   :  { %120 = vmatpush.bf16.msra.mxu0 %v251_v0  ;;  %v89_v2 = vld [vmem:[#allocation2] sm:$0xf]  ;;  %v252_v4 = vld [vmem:[#allocation7] sm:$0xff]  ;;  %v255_v11 = vld [vmem:[#allocation8 + $0x8] sm:$0xff]  ;;  %s209_s25 = sshll.u32 %s400_s24, 4  ;;  %s211_s28 = sshll.u32 %s475_s7, 4  ;;  %s210_s25 = int_to_ptr.vmem [resolvable:$true] %s209_s25  ;;  %s212_s28 = int_to_ptr.hbm [resolvable:$true] %s211_s28 }
  0x15   :  { %v253_v3 = vld [vmem:[#allocation7 + $0x8] sm:$0xff]  ;;  %196 = vmatpush.bf16.msra.mxu2 %v255_v11  ;;  %v254_v12 = vld [vmem:[#allocation8] sm:$0xff] }
  0x16   :  { %158 = vmatpush.bf16.msra.mxu1 %v253_v3  ;;  %v263_v5 = vld [vmem:[%s470_s2] ss:$0 sm:$0xff] }
  0x17   :  { %v264_v13 = vld [vmem:[%s472_s4] ss:$0 sm:$0xff] }
  0x18   :  { %121 = vmatpush.bf16.msra.mxu0 %v250_v1  ;;  %v265_v19 = vld [vmem:[%s474_s6] ss:$0 sm:$0xff] }
  0x19   :  { %197 = vmatpush.bf16.msra.mxu2 %v254_v12 }
  0x1a   :  { %159 = vmatpush.bf16.msra.mxu1 %v252_v4 }
  0x1b   :  { %231 = vmatmul.msk.bf16.vlgmr.msra.gmra.mxu0 %vm110_vm0, %v89_v2 }
  0x98   :  { %v123_v6 = vpop.f32.mrf.mxu0 }
  0x99   :  { %v124_v7 = vadd.f32 %v263_v5, %v123_v6 }
  0x9b   :  { %v127_v8 = vmax.f32 %v124_v7, 0.0 }
  0x9d   :  { %v128_v9 = vpack.c.bf16 %v127_v8, %v127_v8 }
  0x9f   :  { %240 = vmatmul.msk.bf16.vlgmr.msra.gmra.mxu1 %vm110_vm0, %v128_v9 }
  0xa0   :  { %v125_v10 = vpop.f32.mrf.mxu0 }
 0x11c   :  { %v161_v14 = vpop.f32.mrf.mxu1 }
 0x11d   :  { %v162_v15 = vadd.f32 %v264_v13, %v161_v14 }
 0x11f   :  { %v165_v16 = vmax.f32 %v162_v15, 0.0 }
 0x121   :  { %v166_v17 = vpack.c.bf16 %v165_v16, %v165_v16 }
 0x123   :  { %249 = vmatmul.msk.bf16.vlgmr.msra.gmra.mxu2 %vm110_vm0, %v166_v17 }
 0x124   :  { %v163_v18 = vpop.f32.mrf.mxu1 }
 0x1a6   :  { %v199_v20 = vpop.f32.mrf.mxu2 }
 0x1a7   :  { %v200_v21 = vadd.f32 %v265_v19, %v199_v20 }
 0x1a9   :  { %203 = vst [vmem:[#allocation10] sm:$0xff] %v200_v21 }
 0x1aa   :  { %214 = dma.vmem_to_hbm [thread:$0]  %s210_s25, 128, %s212_s28, [#allocation4]  }
 0x1ae   :  { %v201_v22 = vpop.f32.mrf.mxu2 }
 0x1af   :  { %392 = dma.done.wait [#allocation4], 128  }
 0x1b0   :  { %393 = vsyncadd [#allocation4], 4294967168 }
 0x1b1   :  { %219 = vsyncpa [#allocation3], 1 }
 0x1b2   :  { %220 = vsyncpa [#allocation6], 1 }
 0x1b3   :  { %221 = vsyncpa [#allocation9], 1 }
 0x1b4   :  { %222 = vsyncpa [#allocation4], 1 }

</bundles_post_ra>
